<compile_context>
chip_gen: v6e
topology: v6e:2x2x1
jax: 0.10.0
libtpu: 0.0.40
codegen_flags: <defaults>
</compile_context>

<pallas_src>
import jax
import jax.numpy as jnp
from jax.experimental import pallas as pl
from jax.experimental.pallas import tpu as pltpu

_LANES = 128
_SUBLANES = 8
_MAX_TILE_ROWS = 512  # 512x128 f32 block = 256 KiB; ~85% of HBM roofline (v6e)


def _round_up(x, m):
    return ((x + m - 1) // m) * m


def _make_critic_loss_kernel(mode):
    """Kernel: accumulate per-block partial sums into a (1, 8, 128) output."""

    def kernel(x_ref, out_ref):
        i = pl.program_id(1)  # reduction (arbitrary) axis

        @pl.when(i == 0)
        def _init():
            out_ref[...] = jnp.zeros_like(out_ref)

        p = x_ref[...].astype(jnp.float32)  # (tile_rows, 128)
        if mode == 'DRE':
            # BCE with target==1: -clamp(log(p), min=-100) == min(-log(p), 100)
            val = jnp.minimum(-jnp.log(p), 100.0)
        else:  # 'WGP'
            val = -p

        tile_rows = val.shape[0]
        # Fold sublane groups (layout-preserving reshape, VPU adds only):
        # (tile_rows, 128) -> (tile_rows//8, 8, 128) -> (8, 128)
        partial = val.reshape(tile_rows // _SUBLANES, _SUBLANES, _LANES).sum(axis=0)
        out_ref[...] += partial[None, :, :]

    return kernel


def critic_loss(preds_fake, mode):
    """Pallas implementation of CriticLoss.forward. Returns a scalar f32."""
    if mode not in ('DRE', 'WGP'):
        raise ValueError(f"unknown mode: {mode}")

    total = preds_fake.size
    rows = (total + _LANES - 1) // _LANES

    # Pick the biggest tile that fits comfortably (block rows multiple of 8).
    if rows <= _MAX_TILE_ROWS:
        tile_rows = _round_up(max(rows, 1), _SUBLANES)
        n_blocks = 1
    else:
        tile_rows = _MAX_TILE_ROWS
        n_blocks = (rows + tile_rows - 1) // tile_rows

    # Split the reduction across TensorCores (helps v7x's 2 TCs; on 1-TC
    # chips it is just a 2-long sequential outer loop).
    n_split = 2 if n_blocks >= 2 else 1
    steps = (n_blocks + n_split - 1) // n_split
    padded_rows = n_split * steps * tile_rows
    padded_total = padded_rows * _LANES

    # Pad with mode-neutral values (each contributes exactly 0 to the sum).
    pad_val = 1.0 if mode == 'DRE' else 0.0
    flat = preds_fake.reshape(-1)
    if padded_total > total:
        flat = jnp.pad(flat, (0, padded_total - total), constant_values=pad_val)
    x2d = flat.reshape(padded_rows, _LANES)

    kernel = _make_critic_loss_kernel(mode)

    sums = pl.pallas_call(
        kernel,
        out_shape=jax.ShapeDtypeStruct((n_split, _SUBLANES, _LANES), jnp.float32),
        grid_spec=pltpu.PrefetchScalarGridSpec(
            num_scalar_prefetch=0,
            grid=(n_split, steps),
            in_specs=[
                pl.BlockSpec(
                    (tile_rows, _LANES),
                    lambda s, i, steps=steps: (s * steps + i, 0),
                )
            ],
            out_specs=pl.BlockSpec(
                (1, _SUBLANES, _LANES), lambda s, i: (s, 0, 0)
            ),
        ),
        compiler_params=pltpu.CompilerParams(
            dimension_semantics=("parallel", "arbitrary")
        ),
    )(x2d)

    # Tiny final reduction + mean over the TRUE element count.
    return jnp.sum(sums) / jnp.float32(total)


def _reference(preds_fake, mode):
    p = preds_fake.astype(jnp.float32)
    if mode == 'DRE':
        return jnp.mean(-jnp.maximum(jnp.log(p), -100.0))
    else:
        return jnp.mean(-p)


if __name__ == "__main__":
    key = jax.random.PRNGKey(0)
    k0, k1, k2 = jax.random.split(key, 3)

    # Critic outputs (post-sigmoid probabilities), NCHW.
    test_shapes = [
        (k0, (2, 4, 16, 16)),   # base case (single small block)
        (k1, (2, 3, 15, 15)),   # ragged size -> exercises padding path
        (k2, (8, 8, 64, 64)),   # large -> multi-block + dual-core split path
    ]

    ok = True
    for kk, shape in test_shapes:
        logits = jax.random.normal(kk, shape, dtype=jnp.float32)
        preds_fake = jax.nn.sigmoid(logits)
        for mode in ("DRE", "WGP"):
            loss = critic_loss(preds_fake, mode)
            jax.block_until_ready(loss)
            ref = _reference(preds_fake, mode)
            if not jnp.allclose(loss, ref, rtol=1e-5, atol=1e-5):
                ok = False
                print(f"MISMATCH shape={shape} mode={mode}: "
                      f"kernel={loss} ref={ref}")

    if ok:
        print("KERNEL_OK")
</pallas_src>

<mosaic_0001>
module attributes {stable_mosaic.version = 11 : i64} {
  func.func @kernel(%arg0: i32, %arg1: i32, %arg2: memref<16x128xf32, #tpu.memory_space<vmem>>, %arg3: memref<1x8x128xf32, #tpu.memory_space<vmem>>) attributes {dimension_semantics = [#tpu.dimension_semantics<parallel>, #tpu.dimension_semantics<arbitrary>], iteration_bounds = array<i64: 1, 1>, scalar_prefetch = 0 : i64, scratch_operands = 0 : i64, tpu.core_type = #tpu.core_type<tc>, window_params = [{transform_indices = @transform_0, window_bounds = array<i64: 16, 128>}, {transform_indices = @transform_1, window_bounds = array<i64: 1, 8, 128>}]} {
    %c0_i32 = arith.constant 0 : i32
    %0 = arith.cmpi eq, %arg1, %c0_i32 : i32
    %1 = arith.extui %0 : i1 to i32
    %c0_i32_0 = arith.constant 0 : i32
    %2 = arith.cmpi ne, %1, %c0_i32_0 : i32
    scf.if %2 {
      %cst_10 = arith.constant 0.000000e+00 : f32
      %15 = vector.broadcast %cst_10 : f32 to vector<1x8x128xf32>
      %c0_11 = arith.constant 0 : index
      %c0_12 = arith.constant 0 : index
      %c0_13 = arith.constant 0 : index
      %16 = vector.load %arg3[%c0_11, %c0_12, %c0_13] : memref<1x8x128xf32, #tpu.memory_space<vmem>>, vector<1x8x128xf32>
      tpu.vector_store %arg3[%c0_11, %c0_12, %c0_13], %15 {strides = array<i32>} : memref<1x8x128xf32, #tpu.memory_space<vmem>>, vector<1x8x128xf32>,
    } else {
    }
    %c0 = arith.constant 0 : index
    %c0_1 = arith.constant 0 : index
    %3 = vector.load %arg2[%c0, %c0_1] : memref<16x128xf32, #tpu.memory_space<vmem>>, vector<16x128xf32>
    %4 = math.log %3 : vector<16x128xf32>
    %cst = arith.constant 0.000000e+00 : f32
    %5 = vector.broadcast %cst : f32 to vector<16x128xf32>
    %6 = arith.subf %5, %4 : vector<16x128xf32>
    %cst_2 = arith.constant 1.000000e+02 : f32
    %7 = vector.broadcast %cst_2 : f32 to vector<16x128xf32>
    %8 = arith.minimumf %6, %7 : vector<16x128xf32>
    %9 = vector.shape_cast %8 : vector<16x128xf32> to vector<2x8x128xf32>
    %cst_3 = arith.constant dense<0.000000e+00> : vector<8x128xf32>
    %10 = vector.multi_reduction <add>, %9, %cst_3 [0] : vector<2x8x128xf32> to vector<8x128xf32>
    %c0_4 = arith.constant 0 : index
    %c0_5 = arith.constant 0 : index
    %c0_6 = arith.constant 0 : index
    %11 = vector.load %arg3[%c0_4, %c0_5, %c0_6] : memref<1x8x128xf32, #tpu.memory_space<vmem>>, vector<1x8x128xf32>
    %12 = vector.shape_cast %10 : vector<8x128xf32> to vector<1x8x128xf32>
    %13 = arith.addf %11, %12 : vector<1x8x128xf32>
    %c0_7 = arith.constant 0 : index
    %c0_8 = arith.constant 0 : index
    %c0_9 = arith.constant 0 : index
    %14 = vector.load %arg3[%c0_7, %c0_8, %c0_9] : memref<1x8x128xf32, #tpu.memory_space<vmem>>, vector<1x8x128xf32>
    tpu.vector_store %arg3[%c0_7, %c0_8, %c0_9], %13 {strides = array<i32>} : memref<1x8x128xf32, #tpu.memory_space<vmem>>, vector<1x8x128xf32>,
    return
  }
  func.func @transform_0(%arg0: i32, %arg1: i32) -> (i32, i32) {
    %c1_i32 = arith.constant 1 : i32
    %0 = arith.muli %arg0, %c1_i32 : i32
    %1 = arith.addi %0, %arg1 : i32
    %c0_i32 = arith.constant 0 : i32
    %c0_i32_0 = arith.constant 0 : i32
    return %1, %c0_i32 : i32, i32
  }
  func.func @transform_1(%arg0: i32, %arg1: i32) -> (i32, i32, i32) {
    %c0_i32 = arith.constant 0 : i32
    %c0_i32_0 = arith.constant 0 : i32
    %c0_i32_1 = arith.constant 0 : i32
    return %arg0, %c0_i32, %c0_i32_0 : i32, i32, i32
  }
}

</mosaic_0001>

<bundles_post_ra>
// kernel: tpu_custom_call.1
= control target key start
LH: loop header
LB: loop body
LE: loop exit
PB: predicated region body
PF: predicated region fallthrough
CT: control target
= control target key end

     0   :  { %6 = vsyncpa [#allocation3], 0  ;;  %s136_s0 = inlined_call_operand.hbm [shape: f32[16,128], index: 0, kind: input, shape index: {}]   ;;  %s137_s1 = inlined_call_operand.hbm [shape: f32[1,8,128], index: 1, kind: output, shape index: {}]  }
   0x1   :  { %7 = vsyncpa [#allocation4], 0  ;;  %s116_s6 = smov [#allocation2]  }
   0x2   :  { %s17_s7 = sshll.u32 %s116_s6, 4  ;;  %s18_s7 = int_to_ptr.vmem [resolvable:$true] %s17_s7 }
   0x3   :  { %s80_s8 = scalar_lea.vmem %s18_s7, 256  ;;  %p85_p1 = scmp.lt.s32.totalorder %s18_s7, %s18_s7 }
   0x4   :  { %p81_p0 = scmp.ne.s32.totalorder %s18_s7, %s80_s8  ;;  %p86_p2 = scmp.lt.s32.totalorder %s80_s8, %s80_s8 }
   0x6   :  { %p87_p3 = por %p86_p2, %p85_p1 }
   0x8   :  { %p88_p4 = pnand %p87_p3, %p81_p0 }
   0xa   :  { %91 = shalt.err (!%p88_p4)
}
   0xb   :  { %s117_s9 = smov 128   ;;  %s118_s10 = smov 8  }
   0xc   :  { %23 = dma.hbm_to_vmem [thread:$0]  %s136_s0, 256, %s18_s7, [#allocation3], %s117_s9, %s117_s9, %s118_s10  }
   0xd   :  { %112 = dma.done.wait [#allocation3], 256  }
   0xe   :  { %113 = vsyncadd [#allocation3], 4294967040  ;;  %v34_v0 = vld [vmem:[#allocation2] sm:$0xff]  ;;  %v35_v1 = vld [vmem:[#allocation2 + $0x8] sm:$0xff]  ;;  %s119_s13 = smov [#allocation5]  }
   0xf   :  { %68 = vlog2.f32 %v34_v0  ;;  %s54_s14 = sshll.u32 %s119_s13, 4  ;;  %s55_s14 = int_to_ptr.vmem [resolvable:$true] %s54_s14 }
  0x10   :  { %70 = vlog2.f32 %v35_v1  ;;  %s92_s0 = scalar_lea.vmem %s55_s14, 128  ;;  %p97_p6 = scmp.lt.s32.totalorder %s55_s14, %s55_s14 }
  0x11   :  { %p93_p5 = scmp.ne.s32.totalorder %s55_s14, %s92_s0  ;;  %p98_p7 = scmp.lt.s32.totalorder %s92_s0, %s92_s0 }
  0x13   :  { %p99_p8 = por %p98_p7, %p97_p6 }
  0x15   :  { %p100_p9 = pnand %p99_p8, %p93_p5 }
  0x1c   :  { %v69_v2 = vpop.eup %68 }
  0x1d   :  { %v71_v3 = vpop.eup %70  ;;  %v37_v4 = vmul.f32 0.6931472, %v69_v2 }
  0x1e   :  { %v39_v5 = vmul.f32 0.6931472, %v71_v3 }
  0x1f   :  { %v40_v6 = vsub.f32 0.0, %v37_v4 }
  0x20   :  { %v41_v7 = vsub.f32 0.0, %v39_v5 }
  0x21   :  { %v42_v8 = vmin.f32 %v40_v6, 100.0 }
  0x22   :  { %v43_v9 = vmin.f32 %v41_v7, 100.0 }
  0x24   :  { %v44_v10 = vadd.f32 %v43_v9, %v42_v8 }
  0x26   :  { %47 = vst [vmem:[#allocation5] sm:$0xff] %v44_v10 }
  0x27   :  { %103 = shalt.err (!%p100_p9)
}
  0x28   :  { %57 = dma.vmem_to_hbm [thread:$0]  %s55_s14, 128, %s137_s1, [#allocation4]  }
  0x29   :  { %114 = dma.done.wait [#allocation4], 128  }
  0x2a   :  { %115 = vsyncadd [#allocation4], 4294967168 }
  0x2b   :  { %61 = vsyncpa [#allocation3], 1 }
  0x2c   :  { %62 = vsyncpa [#allocation4], 1 }

</bundles_post_ra>
